<compile_context>
chip_gen: v7x
topology: tpu7x:2x2x1
jax: 0.10.0
libtpu: 0.0.40
codegen_flags: <defaults>
</compile_context>

<pallas_src>
import functools

import jax
import jax.numpy as jnp
from jax import lax
from jax.experimental import pallas as pl
from jax.experimental.pallas import tpu as pltpu


def _imgnn_kernel(x_hbm_ref, w1t_ref, w2t_ref, o_ref, x_vmem_ref, *, eps):
    # x_hbm_ref : [B, input_dim]      bf16, raw HBM ref (memory_space=pl.ANY)
    # w1t_ref   : [input_dim, TM]     bf16, mid-tile k of W1^T ([in, mid])
    # w2t_ref   : [TM, output_dim]    bf16, mid-tile k of W2^T ([mid, out])
    # o_ref     : [B, output_dim]     f32 output, VMEM-resident across the grid
    # x_vmem_ref: [B, input_dim]      bf16 scratch; x staged here once at k==0
    k = pl.program_id(0)

    @pl.when(k == 0)
    def _():
        # One-time x stage (avoids double-buffering x) and accumulator init.
        pltpu.sync_copy(x_hbm_ref, x_vmem_ref)
        o_ref[...] = jnp.zeros_like(o_ref)

    # Linear 1 (bias=False), mid-dim tile: h = x @ W1^T[:, k-tile] -> [B, TM].
    h = jnp.dot(x_vmem_ref[...], w1t_ref[...], preferred_element_type=jnp.float32)

    # BatchNorm1d(affine=False), training semantics: batch statistics, biased
    # variance, eps=1e-5.  Stats are per-feature over the full batch (B is
    # entirely resident in this block), so a mid-dim tile is self-contained.
    mean = jnp.mean(h, axis=0, keepdims=True)
    centered = h - mean
    var = jnp.mean(centered * centered, axis=0, keepdims=True)
    h = centered * lax.rsqrt(var + eps)

    # ReLU.
    h = jnp.maximum(h, 0.0)

    # TODO(synk): Dropout(0.5) is stochastic; implemented as eval-mode identity
    # (a pltpu.prng_random_bits mask would give train mode but cannot match
    # torch's RNG stream bit-exactly).

    # Linear 2 (bias=False): accumulate directly into the resident output.
    o_ref[...] += jnp.dot(
        h.astype(w2t_ref.dtype), w2t_ref[...], preferred_element_type=jnp.float32
    )


def _vmem_estimate(batch, input_dim, tm, output_dim):
    """Rough per-step VMEM footprint (bytes)."""
    bf16, f32 = 2, 4
    x_b = batch * input_dim * bf16            # staged once (single buffer)
    w1_b = 2 * input_dim * tm * bf16          # double-buffered mid-tile
    w2_b = 2 * tm * output_dim * bf16         # double-buffered mid-tile
    o_b = batch * output_dim * f32            # resident output accumulator
    h_b = batch * tm * f32                    # matmul-1 / BN / ReLU intermediate
    return x_b + w1_b + w2_b + o_b + h_b


def _pick_tile_mid(batch, input_dim, mid_dim, output_dim, budget=44 << 20):
    # Prefer a single grid step (tm = mid_dim) when it fits; otherwise the
    # largest 128-multiple tile within a budget that leaves headroom on v7x's
    # 64 MiB VMEM (v5e/v6e have 128 MiB, so the same choice is safe there).
    candidates = [mid_dim] + [t for t in (1024, 512, 256, 128) if t < mid_dim]
    for tm in candidates:
        if mid_dim % tm != 0:
            continue
        if _vmem_estimate(batch, input_dim, tm, output_dim) <= budget:
            return tm
    return 128 if mid_dim % 128 == 0 else mid_dim


def imgnn_forward(x, w1, w2, *, eps=1e-5, tile_mid=None):
    """ImgNN forward.

    x : [B, input_dim].  w1: [mid_dim, input_dim], w2: [output_dim, mid_dim]
    (torch nn.Linear layout).  The weights are cast to bf16 and transposed to
    [in, out] / [mid, out] here — in production do both once at init so no
    per-call work is needed.
    """
    B, input_dim = x.shape
    mid_dim = w1.shape[0]
    output_dim = w2.shape[0]

    # bf16 MXU operands (f32 accumulation inside the kernel); one-time layout
    # change so both contractions are plain NN matmuls (no XLU transposes).
    x = jnp.asarray(x).astype(jnp.bfloat16)
    w1t = jnp.asarray(w1).astype(jnp.bfloat16).T   # [input_dim, mid_dim]
    w2t = jnp.asarray(w2).astype(jnp.bfloat16).T   # [mid_dim, output_dim]

    tm = tile_mid if tile_mid is not None else _pick_tile_mid(
        B, input_dim, mid_dim, output_dim
    )
    assert mid_dim % tm == 0, (mid_dim, tm)
    nk = mid_dim // tm  # reduction over mid-dim tiles

    est = _vmem_estimate(B, input_dim, tm, output_dim)
    vmem_limit = int(min(64 << 20, max(32 << 20, 2 * est)))

    kernel = functools.partial(_imgnn_kernel, eps=eps)

    # Advisory cost hint (no nj factors: W1 streamed once, matmul-1 done once).
    flops = 2 * B * input_dim * mid_dim + 2 * B * mid_dim * output_dim
    bytes_accessed = (
        B * input_dim * 2
        + input_dim * mid_dim * 2
        + mid_dim * output_dim * 2
        + B * output_dim * 4
    )

    return pl.pallas_call(
        kernel,
        out_shape=jax.ShapeDtypeStruct((B, output_dim), jnp.float32),
        grid_spec=pltpu.PrefetchScalarGridSpec(
            num_scalar_prefetch=0,
            grid=(nk,),
            in_specs=[
                # x: raw HBM ref; staged into VMEM scratch once at k==0.
                pl.BlockSpec(memory_space=pl.ANY),
                # W1^T mid-dim tile (streamed from HBM exactly once overall).
                pl.BlockSpec((input_dim, tm), lambda k: (0, k)),
                # W2^T mid-dim tile.
                pl.BlockSpec((tm, output_dim), lambda k: (k, 0)),
            ],
            # Full, lane-dense output tile; constant index => VMEM-resident
            # accumulator across the reduction axis.
            out_specs=pl.BlockSpec((B, output_dim), lambda k: (0, 0)),
            scratch_shapes=[pltpu.VMEM((B, input_dim), jnp.bfloat16)],
        ),
        compiler_params=pltpu.CompilerParams(
            dimension_semantics=("arbitrary",),
            vmem_limit_bytes=vmem_limit,
        ),
        cost_estimate=pl.CostEstimate(
            flops=flops,
            transcendentals=mid_dim,
            bytes_accessed=bytes_accessed,
        ),
    )(x, w1t, w2t)


def _reference_forward(x, w1, w2, eps=1e-5):
    """Plain-JAX reference mirroring the PyTorch forward (train-mode BN, no
    dropout) at the kernel's precision: bf16 matmul operands, f32 accumulation,
    f32 BN/ReLU."""
    xb = x.astype(jnp.bfloat16)
    w1b = w1.astype(jnp.bfloat16)
    w2b = w2.astype(jnp.bfloat16)
    h = jnp.dot(xb, w1b.T, preferred_element_type=jnp.float32)
    mean = jnp.mean(h, axis=0, keepdims=True)
    var = jnp.mean((h - mean) ** 2, axis=0, keepdims=True)
    h = (h - mean) * lax.rsqrt(var + eps)
    h = jnp.maximum(h, 0.0)
    return jnp.dot(h.astype(jnp.bfloat16), w2b.T, preferred_element_type=jnp.float32)


if __name__ == "__main__":
    # Small but module-consistent shapes (module defaults scaled down):
    # batch=8, input_dim=256, mid_dim=256, output_dim=128.
    B, INPUT_DIM, MID_DIM, OUTPUT_DIM = 8, 256, 256, 128

    key = jax.random.PRNGKey(0)
    kx, k1, k2 = jax.random.split(key, 3)

    x = jax.random.normal(kx, (B, INPUT_DIM), dtype=jnp.float32)
    # torch nn.Linear weight layout: [out_features, in_features].
    w1 = jax.random.normal(k1, (MID_DIM, INPUT_DIM), dtype=jnp.float32) / jnp.sqrt(
        INPUT_DIM
    )
    w2 = jax.random.normal(k2, (OUTPUT_DIM, MID_DIM), dtype=jnp.float32) / jnp.sqrt(
        MID_DIM
    )

    # tile_mid=128 so the toy shape exercises the pipelined mid-dim
    # accumulation path (256 // 128 = 2 reduction steps).
    out = imgnn_forward(x, w1, w2, tile_mid=128)
    out = jax.block_until_ready(out)

    # Also exercise the single-step (auto-tiled) path.
    out_single = jax.block_until_ready(imgnn_forward(x, w1, w2))

    ref = _reference_forward(x, w1, w2)
    assert out.shape == (B, OUTPUT_DIM), out.shape
    assert jnp.allclose(out, ref, atol=2e-3, rtol=2e-3), float(
        jnp.max(jnp.abs(out - ref))
    )
    assert jnp.allclose(out_single, ref, atol=2e-3, rtol=2e-3), float(
        jnp.max(jnp.abs(out_single - ref))
    )

    print("KERNEL_OK")
</pallas_src>

<mosaic_0001>
module attributes {stable_mosaic.version = 11 : i64} {
  func.func @_imgnn_kernel(%arg0: i32, %arg1: memref<8x256xbf16, #tpu.memory_space<any>>, %arg2: memref<256x128xbf16, #tpu.memory_space<vmem>>, %arg3: memref<128x128xbf16, #tpu.memory_space<vmem>>, %arg4: memref<8x128xf32, #tpu.memory_space<vmem>>, %arg5: memref<8x256xbf16, #tpu.memory_space<vmem>>) attributes {dimension_semantics = [#tpu.dimension_semantics<arbitrary>], iteration_bounds = array<i64: 2>, scalar_prefetch = 0 : i64, scratch_operands = 1 : i64, tpu.core_type = #tpu.core_type<tc>, window_params = [{}, {transform_indices = @transform_1, window_bounds = array<i64: 256, 128>}, {transform_indices = @transform_2, window_bounds = array<i64: 128, 128>}, {pipeline_mode = #tpu.pipeline_mode<synchronous>, transform_indices = @transform_3, window_bounds = array<i64: 8, 128>}]} {
    %c0_i32 = arith.constant 0 : i32
    %0 = arith.cmpi eq, %arg0, %c0_i32 : i32
    %1 = arith.extui %0 : i1 to i32
    %c0_i32_0 = arith.constant 0 : i32
    %2 = arith.cmpi ne, %1, %c0_i32_0 : i32
    scf.if %2 {
      "tpu.region"() ({
        %32 = tpu.sem_alloc : memref<!tpu.dma_semaphore, #tpu.memory_space<semaphore_mem>>
        tpu.enqueue_dma source(%arg1 : memref<8x256xbf16, #tpu.memory_space<any>>) target(%arg5 : memref<8x256xbf16, #tpu.memory_space<vmem>>) target_semaphore(%32 : memref<!tpu.dma_semaphore, #tpu.memory_space<semaphore_mem>>)
        tpu.wait_dma2 semaphore(%32 : memref<!tpu.dma_semaphore, #tpu.memory_space<semaphore_mem>>) src(%arg1 : memref<8x256xbf16, #tpu.memory_space<any>>) dst(%arg5 : memref<8x256xbf16, #tpu.memory_space<vmem>>)
        tpu.yield
      }) : () -> ()
      %cst_17 = arith.constant 0.000000e+00 : f32
      %30 = vector.broadcast %cst_17 : f32 to vector<8x128xf32>
      %c0_18 = arith.constant 0 : index
      %c0_19 = arith.constant 0 : index
      %31 = vector.load %arg4[%c0_18, %c0_19] : memref<8x128xf32, #tpu.memory_space<vmem>>, vector<8x128xf32>
      tpu.vector_store %arg4[%c0_18, %c0_19], %30 {strides = array<i32>} : memref<8x128xf32, #tpu.memory_space<vmem>>, vector<8x128xf32>,
    } else {
    }
    %c0 = arith.constant 0 : index
    %c0_1 = arith.constant 0 : index
    %3 = vector.load %arg5[%c0, %c0_1] : memref<8x256xbf16, #tpu.memory_space<vmem>>, vector<8x256xbf16>
    %c0_2 = arith.constant 0 : index
    %c0_3 = arith.constant 0 : index
    %4 = vector.load %arg2[%c0_2, %c0_3] : memref<256x128xbf16, #tpu.memory_space<vmem>>, vector<256x128xbf16>
    %cst = arith.constant dense<0.000000e+00> : vector<8x128xf32>
    %5 = tpu.matmul %3, %4, %cst {dimension_numbers = #tpu.dot_dimension_numbers<[1], [0], [0], [1], [0, 0, 1, 1], [], []>} : vector<8x256xbf16>, vector<256x128xbf16>, vector<8x128xf32> -> vector<8x128xf32>
    %cst_4 = arith.constant dense<0.000000e+00> : vector<128xf32>
    %6 = vector.multi_reduction <add>, %5, %cst_4 [0] : vector<8x128xf32> to vector<128xf32>
    %7 = vector.shape_cast %6 : vector<128xf32> to vector<1x128xf32>
    %cst_5 = arith.constant 8.000000e+00 : f32
    %8 = vector.broadcast %cst_5 : f32 to vector<1x128xf32>
    %9 = arith.divf %7, %8 : vector<1x128xf32>
    %10 = vector.broadcast %9 : vector<1x128xf32> to vector<8x128xf32>
    %11 = arith.subf %5, %10 : vector<8x128xf32>
    %12 = arith.mulf %11, %11 : vector<8x128xf32>
    %cst_6 = arith.constant dense<0.000000e+00> : vector<128xf32>
    %13 = vector.multi_reduction <add>, %12, %cst_6 [0] : vector<8x128xf32> to vector<128xf32>
    %14 = vector.shape_cast %13 : vector<128xf32> to vector<1x128xf32>
    %cst_7 = arith.constant 8.000000e+00 : f32
    %15 = vector.broadcast %cst_7 : f32 to vector<1x128xf32>
    %16 = arith.divf %14, %15 : vector<1x128xf32>
    %cst_8 = arith.constant 9.99999974E-6 : f32
    %17 = vector.broadcast %cst_8 : f32 to vector<1x128xf32>
    %18 = arith.addf %16, %17 : vector<1x128xf32>
    %19 = math.rsqrt %18 : vector<1x128xf32>
    %20 = vector.broadcast %19 : vector<1x128xf32> to vector<8x128xf32>
    %21 = arith.mulf %11, %20 : vector<8x128xf32>
    %cst_9 = arith.constant 0.000000e+00 : f32
    %22 = vector.broadcast %cst_9 : f32 to vector<8x128xf32>
    %23 = arith.maximumf %21, %22 : vector<8x128xf32>
    %c0_10 = arith.constant 0 : index
    %c0_11 = arith.constant 0 : index
    %24 = vector.load %arg4[%c0_10, %c0_11] : memref<8x128xf32, #tpu.memory_space<vmem>>, vector<8x128xf32>
    %25 = arith.truncf %23 : vector<8x128xf32> to vector<8x128xbf16>
    %c0_12 = arith.constant 0 : index
    %c0_13 = arith.constant 0 : index
    %26 = vector.load %arg3[%c0_12, %c0_13] : memref<128x128xbf16, #tpu.memory_space<vmem>>, vector<128x128xbf16>
    %cst_14 = arith.constant dense<0.000000e+00> : vector<8x128xf32>
    %27 = tpu.matmul %25, %26, %cst_14 {dimension_numbers = #tpu.dot_dimension_numbers<[1], [0], [0], [1], [0, 0, 1, 1], [], []>} : vector<8x128xbf16>, vector<128x128xbf16>, vector<8x128xf32> -> vector<8x128xf32>
    %28 = arith.addf %24, %27 : vector<8x128xf32>
    %c0_15 = arith.constant 0 : index
    %c0_16 = arith.constant 0 : index
    %29 = vector.load %arg4[%c0_15, %c0_16] : memref<8x128xf32, #tpu.memory_space<vmem>>, vector<8x128xf32>
    tpu.vector_store %arg4[%c0_15, %c0_16], %28 {strides = array<i32>} : memref<8x128xf32, #tpu.memory_space<vmem>>, vector<8x128xf32>,
    return
  }
  func.func @transform_1(%arg0: i32) -> (i32, i32) {
    %c0_i32 = arith.constant 0 : i32
    %c0_i32_0 = arith.constant 0 : i32
    return %c0_i32, %arg0 : i32, i32
  }
  func.func @transform_2(%arg0: i32) -> (i32, i32) {
    %c0_i32 = arith.constant 0 : i32
    %c0_i32_0 = arith.constant 0 : i32
    return %arg0, %c0_i32 : i32, i32
  }
  func.func @transform_3(%arg0: i32) -> (i32, i32) {
    %c0_i32 = arith.constant 0 : i32
    %c0_i32_0 = arith.constant 0 : i32
    %c0_i32_1 = arith.constant 0 : i32
    return %c0_i32, %c0_i32_0 : i32, i32
  }
}

</mosaic_0001>

<bundles_post_ra>
// kernel: tpu_custom_call.1
= control target key start
LH: loop header
LB: loop body
LE: loop exit
PB: predicated region body
PF: predicated region fallthrough
CT: control target
= control target key end

     0   :  { %8 = vsyncpa [#allocation4], 0  ;;  %s1179_s0 = inlined_call_operand.hbm [shape: bf16[8,256], index: 0, kind: input, shape index: {}]   ;;  %s1180_s1 = inlined_call_operand.hbm [shape: bf16[256,256], index: 1, kind: input, shape index: {}]   ;;  %s1181_s2 = inlined_call_operand.hbm [shape: bf16[256,128], index: 2, kind: input, shape index: {}]   ;;  %s1182_s3 = inlined_call_operand.hbm [shape: f32[8,128], index: 3, kind: output, shape index: {}]  }
   0x1   :  { %10 = vsyncpa [#allocation4 + $0x1], 0 }
   0x2   :  { %11 = vsyncpa [#allocation7], 0 }
   0x3   :  { %13 = vsyncpa [#allocation7 + $0x1], 0 }
   0x4   :  { %14 = vsyncpa [#allocation5], 0  ;;  %s961_s12 = smov 0   ;;  %s963_s13 = smov 0  }
   0x5   :  { %s965_s14 = smov 0   ;;  %s967_s15 = smov 0  }
   0x6 LB: > { %s980_s16 = sadd.s32 4294967295, %s929_s15   ;;  %s983_s17 = sadd.s32 1, %s929_s15   ;;  %s929_s15 = sphi %s967_s15, %s1191_s15   ;;  %s925_s14 = sphi %s965_s14, %s1190_s14   ;;  %s921_s13 = sphi %s963_s13, %s1189_s13   ;;  %s917_s12 = sphi %s961_s12, %s1188_s12  }
   0x7   : > { %s24_s18 = ssub.s32 %s929_s15, %s983_s17  ;;  %s27_s19 = sadd.s32 1, %s925_s14 }
   0x8   : > { %p25_p0 = scmp.eq.s32.totalorder %s24_s18, 0  ;;  %p34_p1 = scmp.ne.s32.totalorder %s925_s14, %s921_s13 }
   0x9   : > { %p35_p2 = scmp.eq.s32.totalorder %s929_s15, 0  ;;  %p40_p3 = scmp.ne.s32.totalorder %s921_s13, %s917_s12 }
   0xa   : > { %s993_s20 = scalar_select %p25_p0, %s925_s14, %s27_s19  }
   0xb   : > { %p36_p4 = por %p35_p2, %p34_p1  ;;  %p41_p5 = scmp.eq.s32.totalorder %s980_s16, 0 }
   0xc   : > { %p706_p6 = scmp.lt.s32.totalorder %s929_s15, 2  ;;  %s1002_s22 = sand.u32 1, %s925_s14  }
   0xd   : > { %p997_p7 = por %p41_p5, %p40_p3  ;;  %s600_s23 = sshll.u32 %s1002_s22, 7 }
   0xe   : > { %s601_s24 = sshll.u32 %s929_s15, 6  ;;  %s115_s28 = scalar_lea.vmem [#allocation3], %s600_s23 }
   0xf   : > { %s1184_s21 = scalar_select %p997_p7, 1, 0 }
  0x10   : > { %s1009_s27 = scalar_lea.hbm %s1180_s1, %s601_s24  ;;  %s121_s29 = sshll.u32 %s115_s28, 4  ;;  %s1011_s29 = int_to_ptr.vmem [resolvable:$true] %s121_s29 }
  0x11   : > { %p1013_p8 = pnand %p706_p6, %p36_p4  ;;  %s112_s4 = scalar_lea.sflag [#allocation4], %s1002_s22 }
  0x12   : > { %s777_s5 = scalar_lea.hbm %s1009_s27, 2048  ;;  %s782_s8 = scalar_lea.hbm %s1180_s1, 4096 }
  0x13   : > { %p778_p9 = scmp.ne.s32.totalorder %s1009_s27, %s777_s5  ;;  %p779_p10 = pneg %p1013_p8 }
  0x14   : > { %p783_p13 = scmp.lt.u32.totalorder %s1009_s27, %s1180_s1  ;;  %p784_p0 = scmp.lt.u32.totalorder %s782_s8, %s777_s5 }
  0x15   : > { %p780_p11 = pnand %p779_p10, %p778_p9  ;;  %p786_p2 = scmp.lt.u32.totalorder %s777_s5, %s1009_s27 }
  0x16   : > { %p785_p1 = por %p784_p0, %p783_p13 }
  0x17   : > { %p781_p12 = pneg %p780_p11 }
  0x18   : > { %p787_p3 = por %p786_p2, %p785_p1 }
  0x1a   : > { %p788_p4 = pnand %p787_p3, %p781_p12 }
  0x1c   : > { %791 = shalt.err (!%p788_p4)
}
  0x1d   : > { %s792_s11 = scalar_lea.vmem %s1011_s29, 2048  ;;  %s931_s12 = smov [#allocation3]  }
  0x1e   : > { %p793_p5 = scmp.ne.s32.totalorder %s1011_s29, %s792_s11  ;;  %s797_s18 = sshll.u32 %s931_s12, 4  ;;  %s798_s18 = int_to_ptr.vmem [resolvable:$false] %s797_s18 }
  0x1f   : > { %s799_s19 = scalar_lea.vmem %s798_s18, 4096  ;;  %p800_p11 = scmp.lt.s32.totalorder %s1011_s29, %s798_s18 }
  0x20   : > { %p795_p6 = pnand %p793_p5, %p779_p10  ;;  %p801_p13 = scmp.lt.s32.totalorder %s799_s19, %s792_s11 }
  0x22   : > { %p796_p9 = pneg %p795_p6  ;;  %p802_p0 = por %p801_p13, %p800_p11 }
  0x24   : > { %p803_p1 = pnand %p802_p0, %p796_p9 }
  0x26   : > { %806 = shalt.err (!%p803_p1)
}
  0x27   : > { %s932_s23 = smov 128   ;;  %s933_s24 = smov 64  }
  0x28   : > { %s934_s25 = smov 4   ;;  %p605_p12 = scmp.ge.s32.totalorder %s929_s15, 1 }
  0x29   : > { %702 = dma.hbm_to_vmem [thread:$0]  (!%p1013_p8), %s1009_s27, 2048, %s1011_s29, %s112_s4, %s932_s23, %s933_s24, %s934_s25  }
  0x2a   : > { %p150_p2 = scmp.lt.s32.totalorder %s929_s15, 3  ;;  %s602_s26 = sshll.u32 %s1002_s22, 6 }
  0x2b   : > { %s639_s5 = sshll.u32 %s929_s15, 10  ;;  %s135_s6 = scalar_lea.vmem [#allocation6], %s602_s26 }
  0x2c   : > { %p1050_p3 = pnand %p605_p12, %p150_p2  ;;  %s142_s7 = sshll.u32 %s135_s6, 4  ;;  %s1060_s7 = int_to_ptr.vmem [resolvable:$true] %s142_s7 }
  0x2d   : > { %s1058_s10 = scalar_lea.hbm %s1181_s2, %s639_s5  ;;  %s132_s27 = scalar_lea.sflag [#allocation7], %s1002_s22 }
  0x2e   : > { %s807_s29 = scalar_lea.hbm %s1058_s10, 1024  ;;  %s812_s11 = scalar_lea.hbm %s1181_s2, 2048 }
  0x2f   : > { %p808_p4 = scmp.ne.s32.totalorder %s1058_s10, %s807_s29  ;;  %p813_p9 = scmp.lt.u32.totalorder %s1058_s10, %s1181_s2 }
  0x30   : > { %p814_p11 = scmp.lt.u32.totalorder %s812_s11, %s807_s29  ;;  %p816_p0 = scmp.lt.u32.totalorder %s807_s29, %s1058_s10 }
  0x31   : > { %p810_p5 = pnand %p808_p4, %p779_p10 }
  0x32   : > { %p815_p13 = por %p814_p11, %p813_p9 }
  0x33   : > { %p811_p6 = pneg %p810_p5 }
  0x34   : > { %p817_p1 = por %p816_p0, %p815_p13 }
  0x36   : > { %p818_p12 = pnand %p817_p1, %p811_p6 }
  0x38   : > { %821 = shalt.err (!%p818_p12)
}
  0x39   : > { %s822_s19 = scalar_lea.vmem %s1060_s7, 1024  ;;  %s935_s23 = smov [#allocation6]  }
  0x3a   : > { %p823_p2 = scmp.ne.s32.totalorder %s1060_s7, %s822_s19  ;;  %s827_s26 = sshll.u32 %s935_s23, 4  ;;  %s828_s26 = int_to_ptr.vmem [resolvable:$false] %s827_s26 }
  0x3b   : > { %s829_s5 = scalar_lea.vmem %s828_s26, 2048  ;;  %p830_p7 = scmp.lt.s32.totalorder %s1060_s7, %s828_s26 }
  0x3c   : > { %p825_p4 = pnand %p823_p2, %p779_p10  ;;  %p831_p9 = scmp.lt.s32.totalorder %s829_s5, %s822_s19 }
  0x3e   : > { %p826_p5 = pneg %p825_p4  ;;  %p832_p11 = por %p831_p9, %p830_p7 }
  0x40   : > { %p833_p13 = pnand %p832_p11, %p826_p5 }
  0x42   : > { %836 = shalt.err (!%p833_p13)
}
  0x43   : > { %705 = dma.hbm_to_vmem [thread:$0]  (!%p1013_p8), %s1058_s10, 1024, %s1060_s7, %s132_s27, %s933_s24, %s933_s24, %s934_s25  }
  0x44   : > { %154 = sbr.rel (%p1050_p3) target bundleno = 635 (0x27b), region = 28  ;;  %s156_s6 = sand.u32 (!%p1050_p3), 1, %s921_s13  }
  0x45   : > { %s606_s8 = sshll.u32 (!%p1050_p3), %s156_s6, 7  ;;  %s157_s9 = scalar_lea.sflag (!%p1050_p3), [#allocation4], %s156_s6 }
  0x46   : > { %s1094_s29 = scalar_lea.vmem (!%p1050_p3), [#allocation3], %s606_s8  ;;  %p1187_p7 = scmp.ne.s32.totalorder (!%p1050_p3), %s1184_s21, 0 }
  0x4b   : > { %902 = dma.done.wait (%p1187_p7), %s157_s9, 2048  }
  0x4c   : > { %904 = vsyncadd (%p1187_p7), %s157_s9, 4294965248  ;;  %s607_s22 = sshll.u32 %s156_s6, 6  ;;  %s166_s30 = scalar_lea.sflag [#allocation7], %s156_s6 }
  0x4d   : > { %s1100_s15 = scalar_lea.vmem [#allocation6], %s607_s22 }
  0x4e   : > { %906 = dma.done.wait (%p1187_p7), %s166_s30, 1024  }
  0x4f   : > { %908 = vsyncadd (%p1187_p7), %s166_s30, 4294966272  ;;  %p608_p8 = scmp.ne.s32.totalorder %s980_s16, 0 }
  0x51   : > { %195 = sbr.rel (%p608_p8) target bundleno = 107 (0x6b), region = 40 }
  0x58   : > { %s936_s24 = smov [#allocation2]   ;;  %s837_s10 = scalar_lea.hbm %s1179_s0, 128 }
  0x59   : > { %s203_s25 = sshll.u32 %s936_s24, 4  ;;  %p838_p10 = scmp.ne.s32.totalorder %s1179_s0, %s837_s10  ;;  %s204_s25 = int_to_ptr.vmem [resolvable:$true] %s203_s25 }
  0x5a   : > { %p841_p3 = scmp.lt.u32.totalorder %s837_s10, %s1179_s0 }
  0x5c   : > { %p843_p6 = pnand %p841_p3, %p838_p10 }
  0x5e   : > { %846 = shalt.err (!%p843_p6)  }
  0x5f   : > { %s847_s21 = scalar_lea.vmem %s204_s25, 128  ;;  %p852_p1 = scmp.lt.s32.totalorder %s204_s25, %s204_s25 }
  0x60   : > { %p848_p0 = scmp.ne.s32.totalorder %s204_s25, %s847_s21  ;;  %p853_p12 = scmp.lt.s32.totalorder %s847_s21, %s847_s21 }
  0x62   : > { %p854_p2 = por %p853_p12, %p852_p1 }
  0x64   : > { %p855_p4 = pnand %p854_p2, %p848_p0 }
  0x66   : > { %858 = shalt.err (!%p855_p4)  }
  0x67   : > { %206 = dma.hbm_to_vmem [thread:$0]  %s1179_s0, 128, %s204_s25, [#allocation9] }
  0x68   : > { %909 = dma.done.wait [#allocation9], 128 }
  0x69   : > { %910 = vsyncadd [#allocation9], 4294967168  ;;  %v937_v0 = vmov 0.0  }
  0x6a   : > { %211 = vst [vmem:[#allocation8] sm:$0xff] %v937_v0 }
  0x6b PF: > { %v749_v1 = vld [vmem:[%s1094_s29 + $0x40] sm:$0xff]   ;;  %v751_v3 = vld [vmem:[%s1094_s29 + $0x48] sm:$0xff]   ;;  %v753_v5 = vld [vmem:[%s1094_s29 + $0x50] sm:$0xff]   ;;  %v938_v21 = vmov 0.0   ;;  %vm939_vm0 = vmmov 0   ;;  %s940_s23 = smov [#allocation8]  }
  0x6c   : > { %v750_v2 = vld [vmem:[%s1094_s29] sm:$0xff]   ;;  %640 = vmatprep.subr.bf16.mxu0 %v749_v1  ;;  %v752_v4 = vld [vmem:[%s1094_s29 + $0x8] sm:$0xff]   ;;  %v754_v6 = vld [vmem:[%s1094_s29 + $0x10] sm:$0xff]   ;;  %671 = vmatprep.subr.bf16.mxu1 %v938_v21  ;;  %s524_s26 = sshll.u32 %s940_s23, 4  ;;  %p707_p5 = scmp.eq.s32.totalorder %s980_s16, 1  ;;  %s525_s26 = int_to_ptr.vmem [resolvable:$true] %s524_s26 }
  0x6d   : > { %641 = vmatpush3.bf16.msra.mxu0 %v750_v2  ;;  %v755_v7 = vld [vmem:[%s1094_s29 + $0x58] sm:$0xff]   ;;  %v757_v9 = vld [vmem:[%s1094_s29 + $0x60] sm:$0xff]   ;;  %v759_v11 = vld [vmem:[%s1094_s29 + $0x68] sm:$0xff]   ;;  %687 = vmatprep.mubr.msk.bf16.mxu1 %vm939_vm0, %v938_v21  ;;  %s859_s5 = scalar_lea.vmem %s525_s26, 128  ;;  %p866_p7 = scmp.lt.s32.totalorder %s525_s26, %s525_s26 }
  0x6e   : > { %642 = vmatprep.subr.bf16.mxu0 %v751_v3  ;;  %v756_v8 = vld [vmem:[%s1094_s29 + $0x18] sm:$0xff]   ;;  %v758_v10 = vld [vmem:[%s1094_s29 + $0x20] sm:$0xff]   ;;  %v760_v13 = vld [vmem:[%s1094_s29 + $0x28] sm:$0xff]   ;;  %p860_p9 = scmp.ne.s32.totalorder %s525_s26, %s859_s5  ;;  %p867_p8 = scmp.lt.s32.totalorder %s859_s5, %s859_s5 }
  0x6f   : > { %v212_v12 = vld [vmem:[#allocation2] sm:$0xff]  ;;  %v761_v15 = vld [vmem:[%s1094_s29 + $0x70] sm:$0xff]   ;;  %v767_v20 = vld [vmem:[%s1100_s15] sm:$0xff]  }
  0x70   : > { %v610_v14 = vcombine.high %v212_v12, %v212_v12  ;;  %v762_v16 = vld [vmem:[%s1094_s29 + $0x30] sm:$0xff]   ;;  %v763_v17 = vld [vmem:[%s1094_s29 + $0x78] sm:$0xff]   ;;  %v609_v19 = vcombine.low %v212_v12, %v212_v12  ;;  %672 = vmatpush3.bf16.msra.mxu1 %v767_v20  ;;  %v768_v22 = vld [vmem:[%s1100_s15 + $0x8] sm:$0xff]   ;;  %p861_p11 = pnand %p860_p9, %p707_p5  ;;  %p868_p10 = por %p867_p8, %p866_p7 }
  0x71   : > { %643 = vmatpush3.bf16.msra.mxu0 %v752_v4  ;;  %v764_v18 = vld [vmem:[%s1094_s29 + $0x38] sm:$0xff]   ;;  %673 = vmatprep.subr.bf16.mxu1 %v938_v21  ;;  %v769_v23 = vld [vmem:[%s1100_s15 + $0x10] sm:$0xff]   ;;  %v771_v25 = vld [vmem:[%s1100_s15 + $0x20] sm:$0xff]  }
  0x72   : > { %644 = vmatprep.subr.bf16.mxu0 %v753_v5  ;;  %380 = vmatprep.mubr.bf16.mxu0 %v610_v14  ;;  %v770_v24 = vld [vmem:[%s1100_s15 + $0x18] sm:$0xff]   ;;  %v772_v26 = vld [vmem:[%s1100_s15 + $0x28] sm:$0xff]   ;;  %v773_v27 = vld [vmem:[%s1100_s15 + $0x30] sm:$0xff]   ;;  %p862_p13 = pneg %p861_p11 }
  0x73   : > { %v774_v28 = vld [vmem:[%s1100_s15 + $0x38] sm:$0xff]   ;;  %v409_v55 = vld [vmem:[#allocation8] sm:$0xff] }
  0x74   : > { %674 = vmatpush3.bf16.msra.mxu1 %v768_v22  ;;  %p869_p3 = pnand %p868_p10, %p862_p13 }
  0x75   : > { %645 = vmatpush3.bf16.msra.mxu0 %v754_v6  ;;  %675 = vmatprep.subr.bf16.mxu1 %v938_v21 }
  0x76   : > { %646 = vmatprep.subr.bf16.mxu0 %v755_v7 }
  0x78   : > { %676 = vmatpush3.bf16.msra.mxu1 %v769_v23 }
  0x79   : > { %647 = vmatpush3.bf16.msra.mxu0 %v756_v8  ;;  %677 = vmatprep.subr.bf16.mxu1 %v938_v21 }
  0x7a   : > { %648 = vmatprep.subr.bf16.mxu0 %v757_v9 }
  0x7c   : > { %678 = vmatpush3.bf16.msra.mxu1 %v770_v24 }
  0x7d   : > { %649 = vmatpush3.bf16.msra.mxu0 %v758_v10  ;;  %679 = vmatprep.subr.bf16.mxu1 %v938_v21 }
  0x7e   : > { %650 = vmatprep.subr.bf16.mxu0 %v759_v11 }
  0x80   : > { %680 = vmatpush3.bf16.msra.mxu1 %v771_v25 }
  0x81   : > { %651 = vmatpush3.bf16.msra.mxu0 %v760_v13  ;;  %681 = vmatprep.subr.bf16.mxu1 %v938_v21 }
  0x82   : > { %652 = vmatprep.subr.bf16.mxu0 %v761_v15 }
  0x84   : > { %682 = vmatpush3.bf16.msra.mxu1 %v772_v26 }
  0x85   : > { %653 = vmatpush3.bf16.msra.mxu0 %v762_v16  ;;  %683 = vmatprep.subr.bf16.mxu1 %v938_v21 }
  0x86   : > { %654 = vmatprep.subr.bf16.mxu0 %v763_v17 }
  0x88   : > { %684 = vmatpush3.bf16.msra.mxu1 %v773_v27 }
  0x89   : > { %655 = vmatpush3.bf16.msra.mxu0 %v764_v18  ;;  %685 = vmatprep.subr.bf16.mxu1 %v938_v21 }
  0x8c   : > { %381 = vmatmul.mubr.bf16.vlgmr.msra.gmra.mrb[0].mxu0 %v609_v19  ;;  %686 = vmatpush3.bf16.msra.mxu1 %v774_v28 }
 0x15f   : > { %v656_v29 = vpop.f32.mrb[0].mxu0 }
 0x160   : > { %v657_v30 = vpop.f32.mrb[1].mxu0 }
 0x161   : > { %v658_v31 = vadd.f32 %v657_v30, %v656_v29  ;;  %v659_v32 = vpop.f32.mrb[2].mxu0 }
 0x162   : > { %v660_v33 = vpop.f32.mrb[3].mxu0 }
 0x163   : > { %v388_v34 = vrot.slane %v658_v31, 4 }
 0x165   : > { %v389_v35 = vadd.f32 %v658_v31, %v388_v34 }
 0x167   : > { %v390_v36 = vrot.slane %v389_v35, 2 }
 0x169   : > { %v391_v37 = vadd.f32 %v390_v36, %v389_v35 }
 0x16b   : > { %v392_v38 = vrot.slane %v391_v37, 1 }
 0x16d   : > { %v393_v39 = vadd.f32 %v392_v38, %v391_v37 }
 0x16f   : > { %v395_v40 = vmul.f32 0.125, %v393_v39 }
 0x171   : > { %v396_v41 = vsub.f32 %v658_v31, %v395_v40 }
 0x173   : > { %v397_v42 = vmul.f32 %v396_v41, %v396_v41 }
 0x175   : > { %v398_v43 = vrot.slane %v397_v42, 4 }
 0x177   : > { %v399_v44 = vadd.f32 %v398_v43, %v397_v42 }
 0x179   : > { %v400_v45 = vrot.slane %v399_v44, 2 }
 0x17b   : > { %v401_v46 = vadd.f32 %v400_v45, %v399_v44 }
 0x17d   : > { %v402_v47 = vrot.slane %v401_v46, 1 }
 0x17f   : > { %v403_v48 = vadd.f32 %v402_v47, %v401_v46 }
 0x181   : > { %v404_v49 = vmul.f32 0.125, %v403_v48 }
 0x183   : > { %v405_v50 = vadd.f32 1e-05, %v404_v49 }
 0x185   : > { %775 = vrsqrt.f32 %v405_v50 }
 0x18f   : > { %v776_v51 = vpop.eup %775 }
 0x190   : > { %v407_v52 = vmul.f32 %v776_v51, %v396_v41 }
 0x192   : > { %v408_v53 = vmax.f32 %v407_v52, 0.0 }
 0x194   : > { %v410_v54 = vpack.c.bf16 %v408_v53, %v408_v53 }
 0x196   : > { %688 = vmatmul.mubr.bf16.vlgmr.msra.gmra.mrb[0].mxu1 %v410_v54 }
 0x269   : > { %v509_v56 = vpop.f32.mrb[0].mxu1 }
 0x26a   : > { %v515_v57 = vadd.f32 %v509_v56, %v409_v55  ;;  %v689_v58 = vpop.f32.mrb[1].mxu1 }
 0x26b   : > { %v512_v59 = vpop.f32.mrb[2].mxu1 }
 0x26c   : > { %516 = vst [vmem:[#allocation8] sm:$0xff] %v515_v57  ;;  %v690_v60 = vpop.f32.mrb[3].mxu1 }
 0x26d   : > { %872 = shalt.err (!%p869_p3)
}
 0x26e   : > { %s873_s9 = scalar_lea.hbm %s1182_s3, 128 }
 0x26f   : > { %p874_p6 = scmp.ne.s32.totalorder %s1182_s3, %s873_s9  ;;  %p879_p12 = scmp.lt.u32.totalorder %s873_s9, %s1182_s3 }
 0x271   : > { %p875_p0 = pnand %p874_p6, %p707_p5 }
 0x273   : > { %p876_p1 = pneg %p875_p0 }
 0x275   : > { %p881_p2 = pnand %p879_p12, %p876_p1 }
 0x277   : > { %884 = shalt.err (!%p881_p2)
}
 0x278   : > { %696 = dma.vmem_to_hbm [thread:$0]  (%p707_p5), %s525_s26, 128, %s1182_s3, [#allocation5]  }
 0x279   : > { %912 = dma.done.wait (%p707_p5), [#allocation5], 128  }
 0x27a   : > { %914 = vsyncadd (%p707_p5), [#allocation5], 4294967168 }
 0x27b PF: > { %p17_p4 = scmp.ge.s32.totalorder %s983_s17, 4   ;;  %s1188_s12 = smov %s921_s13 }
 0x27c   : > { %s1189_s13 = smov %s925_s14  ;;  %s1190_s14 = smov %s993_s20 }
 0x27d   : > { %s1191_s15 = smov %s983_s17  ;;  %19 = sbr.rel (!%p17_p4) target bundleno = 6 (0x6), region = 87 }
 0x284   :  { %537 = vsyncpa [#allocation4], 1 }
 0x285   :  { %539 = vsyncpa [#allocation4 + $0x1], 1 }
 0x286   :  { %540 = vsyncpa [#allocation7], 1 }
 0x287   :  { %542 = vsyncpa [#allocation7 + $0x1], 1 }
 0x288   :  { %543 = vsyncpa [#allocation5], 1 }
 0x289   :  { %545 = vsyncpa [#allocation5 + $0x1], 1 }

</bundles_post_ra>
